<compile_context>
chip_gen: v7x
topology: tpu7x:2x2x1
jax: 0.10.0
libtpu: 0.0.40
codegen_flags: <defaults>
</compile_context>

<pallas_src>
import functools

import numpy as np
import jax
import jax.numpy as jnp
from jax.experimental import pallas as pl
from jax.experimental.pallas import tpu as pltpu


@functools.lru_cache(maxsize=None)
def _roll_sign():
    """Probe pltpu.roll's rotate convention once on-device.

    Returns +1 if pltpu.roll matches jnp.roll (result[i] = x[i - shift]),
    -1 if the rotate direction is inverted.  Keeps the stencil shifts correct
    across toolchain versions for the cost of one tiny kernel launch.
    """
    def probe(x_ref, o_ref):
        o_ref[...] = pltpu.roll(x_ref[...], 1, axis=1)

    x = jnp.broadcast_to(jax.lax.iota(jnp.float32, 128), (8, 128))
    y = pl.pallas_call(probe, out_shape=jax.ShapeDtypeStruct((8, 128), jnp.float32))(x)
    return 1 if float(y[0, 0]) == 127.0 else -1


def _choose_plane_packing(P, H, W):
    """Arrange the P = B*C independent planes into a (PR, PC) grid.

    PC planes go side by side along the lane axis (slab last dim = PC*W),
    PR = P // PC plane-rows go along the sublane axis.  Preference: lane
    extent a multiple of 128 (unmasked, dense vst stores), ideally >= 512
    (measured HBM-roofline sweet spot), choosing the smallest such PC so PR
    (and hence the number of parallel grid steps) stays as large as possible.
    """
    if H % 8 != 0:
        # Block sublane dim must be a multiple of 8 unless it spans the full
        # array, so keep a single plane-row in that case.
        return 1, P
    divisors = [pc for pc in range(1, P + 1) if P % pc == 0]
    for pc in divisors:                       # smallest pc reaching >=512 lanes
        if (pc * W) % 128 == 0 and pc * W >= 512:
            return P // pc, pc
    for pc in divisors:                       # else smallest lane-dense pc
        if (pc * W) % 128 == 0:
            return P // pc, pc
    return 1, P                               # fallback: one full-width block


def _choose_row_block(PR, H, L, itemsize, target_bytes=2 * 1024 * 1024):
    """Plane-rows per grid step: largest divisor of PR whose (RB*H, L) block
    stays under ~2 MiB (2x-in + 2x-out double buffers fit comfortably on all
    generations, incl. v7x's 32 MiB scoped default) while keeping >=2 grid
    steps whenever PR >= 2 so both v7x TensorCores receive work."""
    best = 1
    for rb in range(1, PR + 1):
        if PR % rb:
            continue
        if rb * H * L * itemsize > target_bytes:
            continue
        if PR > 1 and PR // rb < 2:
            continue
        best = rb
    return best


def _make_stencil_kernel(taps, inv_resol, H, W, roll_sign):
    """taps: list of (oy, ox, weight) for the nonzero stencil entries,
    offsets measured from the stencil center."""

    def kernel(x_ref, row_ref, col_ref, o_ref):
        # x_ref/o_ref: (RB*H, PC*W) — RB plane-rows, PC planes per lane row.
        # Upcast once: bf16 inputs DMA narrow, math in f32 on the VPU.
        x = x_ref[...].astype(jnp.float32)
        R, L = x.shape
        # Per-element coordinates inside each packed plane (small int inputs,
        # broadcast once and reused by every tap's border mask).
        row = jnp.broadcast_to(row_ref[...], (R, L))   # y within its plane
        col = jnp.broadcast_to(col_ref[...], (R, L))   # x within its plane

        acc = jnp.zeros((R, L), jnp.float32)
        for oy, ox, w in taps:
            shifted = x
            if oy != 0:  # sublane rotate (XLU slot, co-issues with VPU FMAs)
                shifted = pltpu.roll(shifted, (-oy * roll_sign) % R, axis=0)
            if ox != 0:  # lane rotate (XLU slot)
                shifted = pltpu.roll(shifted, (-ox * roll_sign) % L, axis=1)
            # Zero "same" padding: kill taps whose source pixel falls outside
            # its own plane (image border or a packed-plane boundary; rolled
            # wrap-around lands exactly on these masked positions).
            conds = []
            if oy > 0:
                conds.append(row < H - oy)
            elif oy < 0:
                conds.append(row >= -oy)
            if ox > 0:
                conds.append(col < W - ox)
            elif ox < 0:
                conds.append(col >= -ox)
            if conds:
                valid = functools.reduce(jnp.logical_and, conds)
                shifted = jnp.where(valid, shifted, 0.0)
            acc = acc + w * shifted

        o_ref[...] = (acc * inv_resol).astype(o_ref.dtype)

    return kernel


def conv2d_derivative(x, der_filter, resol):
    """x: (B, C, H, W); der_filter: (1, 1, k, k) shared derivative stencil.
    Returns (B, C, H, W) = depthwise 'same' cross-correlation / resol."""
    B, C, H, W = x.shape
    k = int(der_filter.shape[-1])
    pad = (k - 1) // 2
    P = B * C

    stencil = np.asarray(der_filter, np.float32).reshape(k, k)
    taps = [(dy - pad, dx - pad, float(stencil[dy, dx]))
            for dy in range(k) for dx in range(k) if stencil[dy, dx] != 0.0]

    PR, PC = _choose_plane_packing(P, H, W)
    L = PC * W
    RB = _choose_row_block(PR, H, L, np.dtype(x.dtype).itemsize)
    steps = PR // RB

    # Layout plumbing only (no padding, no compute): pack planes so the kernel
    # sees a lane-dense (PR*H, PC*W) slab.  Toy case: (16, 128).
    xp = x.reshape(PR, PC, H, W).transpose(0, 2, 1, 3).reshape(PR * H, L)

    # Small constant coordinate maps (plane-local row / column index); passed
    # as inputs so the in-kernel masks need no vector integer div/mod.
    row_ids = jnp.asarray(np.tile(np.arange(H, dtype=np.int32), RB)[:, None])  # (RB*H, 1)
    col_ids = jnp.asarray(np.tile(np.arange(W, dtype=np.int32), PC)[None, :])  # (1, L)

    kernel = _make_stencil_kernel(taps, 1.0 / float(resol), H, W, _roll_sign())

    out = pl.pallas_call(
        kernel,
        out_shape=jax.ShapeDtypeStruct((PR * H, L), x.dtype),
        grid=(steps,),
        in_specs=[
            pl.BlockSpec((RB * H, L), lambda r: (r, 0)),   # input slab row-block
            pl.BlockSpec((RB * H, 1), lambda r: (0, 0)),   # row-in-plane ids (reused)
            pl.BlockSpec((1, L), lambda r: (0, 0)),        # col-in-plane ids (reused)
        ],
        out_specs=pl.BlockSpec((RB * H, L), lambda r: (r, 0)),
        compiler_params=pltpu.CompilerParams(
            dimension_semantics=("parallel",),             # shard row-blocks across v7x TCs
            vmem_limit_bytes=32 * 1024 * 1024),            # explicit headroom for bigger tiles
    )(xp, row_ids, col_ids)

    return out.reshape(PR, H, PC, W).transpose(0, 2, 1, 3).reshape(B, C, H, W)


def _reference(x, der_filter, resol):
    """Pure-JAX reference: depthwise cross-correlation, same zero padding."""
    B, C, H, W = x.shape
    k = der_filter.shape[-1]
    pad = (k - 1) // 2
    w = jnp.asarray(der_filter, jnp.float32)  # (1,1,k,k) OIHW
    outs = []
    for i in range(C):
        xi = x[:, i:i + 1, :, :]
        yi = jax.lax.conv_general_dilated(
            xi, w, window_strides=(1, 1), padding=[(pad, pad), (pad, pad)],
            dimension_numbers=("NCHW", "OIHW", "NCHW"))
        outs.append(yi)
    return jnp.concatenate(outs, axis=1) / resol


if __name__ == "__main__":
    # Deterministic setup consistent with the module's typical use
    # (e.g. PhyCRNet laplace operator): kernel_size=5 stencil, resol = dx^2.
    k = 5
    dx = 1.0 / 16.0
    resol = dx * dx
    lapl_op = np.array(
        [[[[0.0,     0.0, -1.0 / 12, 0.0,     0.0],
           [0.0,     0.0,  4.0 / 3,  0.0,     0.0],
           [-1.0/12, 4.0/3, -5.0,    4.0/3, -1.0/12],
           [0.0,     0.0,  4.0 / 3,  0.0,     0.0],
           [0.0,     0.0, -1.0 / 12, 0.0,     0.0]]]],
        dtype=np.float32)  # DerFilter, shape (1, 1, 5, 5)

    B, C, H, W = 2, 4, 16, 16  # 8 planes -> packed into one (16, 128) slab
    key = jax.random.PRNGKey(0)
    x = jax.random.normal(key, (B, C, H, W), dtype=jnp.float32)

    y = jax.block_until_ready(conv2d_derivative(x, lapl_op, resol))

    y_ref = jax.block_until_ready(_reference(x, lapl_op, resol))
    np.testing.assert_allclose(np.asarray(y), np.asarray(y_ref), rtol=1e-5, atol=1e-4)

    print("KERNEL_OK")
</pallas_src>

<mosaic_0001>
module attributes {stable_mosaic.version = 11 : i64} {
  func.func @probe(%arg0: memref<8x128xf32, #tpu.memory_space<vmem>>, %arg1: memref<8x128xf32, #tpu.memory_space<vmem>>) attributes {dimension_semantics = [], scalar_prefetch = 0 : i64, scratch_operands = 0 : i64, tpu.core_type = #tpu.core_type<tc>} {
    %c0 = arith.constant 0 : index
    %c0_0 = arith.constant 0 : index
    %0 = vector.load %arg0[%c0, %c0_0] : memref<8x128xf32, #tpu.memory_space<vmem>>, vector<8x128xf32>
    %c1_i32 = arith.constant 1 : i32
    %1 = tpu.dynamic_rotate %0 by %c1_i32 dim 1 : vector<8x128xf32>, i32 -> vector<8x128xf32>
    %c0_1 = arith.constant 0 : index
    %c0_2 = arith.constant 0 : index
    %2 = vector.load %arg1[%c0_1, %c0_2] : memref<8x128xf32, #tpu.memory_space<vmem>>, vector<8x128xf32>
    tpu.vector_store %arg1[%c0_1, %c0_2], %1 {strides = array<i32>} : memref<8x128xf32, #tpu.memory_space<vmem>>, vector<8x128xf32>,
    return
  }
}

</mosaic_0001>

<bundles_post_ra>
// kernel: tpu_custom_call.1
= control target key start
LH: loop header
LB: loop body
LE: loop exit
PB: predicated region body
PF: predicated region fallthrough
CT: control target
= control target key end

     0   :  { %6 = vsyncpa [#allocation3], 0  ;;  %s128_s0 = inlined_call_operand.hbm [shape: f32[8,128], index: 0, kind: input, shape index: {}]   ;;  %s129_s1 = inlined_call_operand.hbm [shape: f32[8,128], index: 1, kind: output, shape index: {}]  }
   0x1   :  { %7 = vsyncpa [#allocation4], 0  ;;  %s91_s6 = smov [#allocation2]   ;;  %s43_s10 = scalar_lea.hbm %s128_s0, 128 }
   0x2   :  { %s14_s7 = sshll.u32 %s91_s6, 4  ;;  %p44_p0 = scmp.ne.s32.totalorder %s128_s0, %s43_s10  ;;  %s15_s7 = int_to_ptr.vmem [resolvable:$true] %s14_s7 }
   0x3   :  { %p47_p1 = scmp.lt.u32.totalorder %s43_s10, %s128_s0 }
   0x5   :  { %p49_p2 = pnand %p47_p1, %p44_p0 }
   0x7   :  { %52 = shalt.err (!%p49_p2)
}
   0x8   :  { %s53_s15 = scalar_lea.vmem %s15_s7, 128  ;;  %p58_p4 = scmp.lt.s32.totalorder %s15_s7, %s15_s7 }
   0x9   :  { %p54_p3 = scmp.ne.s32.totalorder %s15_s7, %s53_s15  ;;  %p59_p5 = scmp.lt.s32.totalorder %s53_s15, %s53_s15 }
   0xb   :  { %p60_p6 = por %p59_p5, %p58_p4 }
   0xd   :  { %p61_p7 = pnand %p60_p6, %p54_p3 }
   0xf   :  { %64 = shalt.err (!%p61_p7)
}
  0x10   :  { %17 = dma.hbm_to_vmem [thread:$0]  %s128_s0, 128, %s15_s7, [#allocation3]  }
  0x11   :  { %87 = dma.done.wait [#allocation3], 128  }
  0x12   :  { %88 = vsyncadd [#allocation3], 4294967168  ;;  %v21_v0 = vld [vmem:[#allocation2] sm:$0xff]  ;;  %s92_s18 = smov 1   ;;  %s93_s19 = smov [#allocation5]  }
  0x13   :  { %22 = vrot.lane.b32.xlu0 %v21_v0, %s92_s18  ;;  %s31_s20 = sshll.u32 %s93_s19, 4  ;;  %s32_s20 = int_to_ptr.vmem [resolvable:$true] %s31_s20 }
  0x14   :  { %s65_s21 = scalar_lea.vmem %s32_s20, 128  ;;  %p70_p9 = scmp.lt.s32.totalorder %s32_s20, %s32_s20 }
  0x15   :  { %p66_p8 = scmp.ne.s32.totalorder %s32_s20, %s65_s21  ;;  %p71_p10 = scmp.lt.s32.totalorder %s65_s21, %s65_s21 }
  0x17   :  { %p72_p11 = por %p71_p10, %p70_p9 }
  0x19   :  { %p73_p12 = pnand %p72_p11, %p66_p8 }
  0x85   :  { %v23_v1 = vpop.permute.xlu0 %22 }
  0x86   :  { %24 = vst [vmem:[#allocation5] sm:$0xff] %v23_v1 }
  0x87   :  { %76 = shalt.err (!%p73_p12)
}
  0x88   :  { %s77_s0 = scalar_lea.hbm %s129_s1, 128 }
  0x89   :  { %p78_p13 = scmp.ne.s32.totalorder %s129_s1, %s77_s0  ;;  %p81_p0 = scmp.lt.u32.totalorder %s77_s0, %s129_s1 }
  0x8b   :  { %p83_p1 = pnand %p81_p0, %p78_p13 }
  0x8d   :  { %86 = shalt.err (!%p83_p1)
}
  0x8e   :  { %34 = dma.vmem_to_hbm [thread:$0]  %s32_s20, 128, %s129_s1, [#allocation4]  }
  0x8f   :  { %89 = dma.done.wait [#allocation4], 128  }
  0x90   :  { %90 = vsyncadd [#allocation4], 4294967168 }
  0x91   :  { %38 = vsyncpa [#allocation3], 1 }
  0x92   :  { %39 = vsyncpa [#allocation4], 1 }

</bundles_post_ra>
